<compile_context>
chip_gen: v5e
topology: v5e:2x2
jax: 0.10.0
libtpu: 0.0.40
codegen_flags: <defaults>
</compile_context>

<pallas_src>
import functools

import jax
import jax.numpy as jnp
from jax.experimental import pallas as pl
from jax.experimental.pallas import tpu as pltpu


def _round_up(n, m):
    return ((n + m - 1) // m) * m


def _forward_body(x, w1, b1, w2, b2, w3, b3, w4_row, b4):
    """Shared 4-layer MLP body. x / w1..w3 are bf16; accumulation + elementwise in f32."""
    # hidden_layer1 -> relu   (dropout1 == identity in eval mode)
    h = jnp.dot(x, w1, preferred_element_type=jnp.float32) + b1
    h = jnp.maximum(h, 0.0)
    # hidden_layer2 -> relu   (dropout2 == identity in eval mode)
    h = jnp.dot(h.astype(jnp.bfloat16), w2, preferred_element_type=jnp.float32) + b2
    h = jnp.maximum(h, 0.0)
    # hidden_layer3 -> relu
    h = jnp.dot(h.astype(jnp.bfloat16), w3, preferred_element_type=jnp.float32) + b3
    h = jnp.maximum(h, 0.0)
    # output_layer (out_dim == 1): VPU multiply + lane reduction instead of a
    # 1-column MXU matmul (which would be almost all padding).
    pred = jnp.sum(h * w4_row, axis=-1, keepdims=True) + b4
    prob = 1.0 / (1.0 + jnp.exp(-pred))
    return pred, prob


def _mlp_loss_kernel(x_ref, y_ref,
                     w1_ref, b1_ref, w2_ref, b2_ref, w3_ref, b3_ref,
                     w4_ref, b4_ref, out_ref, *, tile_b, batch):
    """Per-tile: logits, probabilities and masked per-row BCE term -> fused [TB, 3]."""
    pred, prob = _forward_body(
        x_ref[...],
        w1_ref[...], b1_ref[...], w2_ref[...], b2_ref[...],
        w3_ref[...], b3_ref[...], w4_ref[...], b4_ref[...])

    # BCELoss(prob, y), PyTorch clamps log terms at -100 for stability.
    y = y_ref[...]
    log_p = jnp.maximum(jnp.log(prob), -100.0)
    log_1mp = jnp.maximum(jnp.log(1.0 - prob), -100.0)
    per_row = -(y * log_p + (1.0 - y) * log_1mp)

    # Zero out batch-padding rows so the wrapper can do sum(...) / B.
    rows = pl.program_id(0) * tile_b + jax.lax.broadcasted_iota(
        jnp.int32, (tile_b, 1), 0)
    per_row = jnp.where(rows < batch, per_row, 0.0)

    out_ref[...] = jnp.concatenate([pred, prob, per_row], axis=-1)


def _mlp_infer_kernel(x_ref,
                      w1_ref, b1_ref, w2_ref, b2_ref, w3_ref, b3_ref,
                      w4_ref, b4_ref, out_ref):
    """Loss-free variant (y is None): fused [TB, 2] output of (logits, probabilities)."""
    pred, prob = _forward_body(
        x_ref[...],
        w1_ref[...], b1_ref[...], w2_ref[...], b2_ref[...],
        w3_ref[...], b3_ref[...], w4_ref[...], b4_ref[...])
    out_ref[...] = jnp.concatenate([pred, prob], axis=-1)


def my_classifier_forward(x, y, params, *, batch_tile=512):
    """Full MyClassifier forward pass as a single batch-tiled Pallas kernel.

    x: [B, input_dim] float; y: [B] targets or None; params: w1..w4 ([in, out]
    layout, i.e. pre-transposed vs. torch.nn.Linear) and b1..b4 ([1, out]).
    """
    B, in_dim = x.shape
    out_dim = params["w4"].shape[1]
    if out_dim != 1:
        # TODO(synk): generalize the head to out_dim > 1 (matmul path); the
        # reference module uses BCELoss + unsqueeze(1), i.e. out_dim == 1.
        raise NotImplementedError("MyClassifier Pallas kernel assumes output_dim == 1")

    # Batch tile: multiple of 8 sublanes, capped by the (padded) batch.
    tb = min(batch_tile, _round_up(B, 8))
    bp = _round_up(B, tb)
    n_tiles = bp // tb

    # bf16 streamed input (halves dominant HBM bytes); pad batch to tile multiple.
    x_bf16 = jnp.pad(x.astype(jnp.bfloat16), ((0, bp - B), (0, 0)))

    # Resident weights: bf16 matmul operands, f32 biases / f32 head row-vector.
    w1 = params["w1"].astype(jnp.bfloat16)
    w2 = params["w2"].astype(jnp.bfloat16)
    w3 = params["w3"].astype(jnp.bfloat16)
    b1 = params["b1"].astype(jnp.float32)
    b2 = params["b2"].astype(jnp.float32)
    b3 = params["b3"].astype(jnp.float32)
    w4_row = params["w4"].astype(jnp.float32).reshape(1, -1)   # [1, hidden//4]
    b4 = params["b4"].astype(jnp.float32).reshape(1, 1)

    weight_args = (w1, b1, w2, b2, w3, b3, w4_row, b4)
    weight_specs = [pl.BlockSpec(w.shape, lambda i: (0, 0)) for w in weight_args]
    x_spec = pl.BlockSpec((tb, in_dim), lambda i: (i, 0))

    compiler_params = pltpu.CompilerParams(
        dimension_semantics=("parallel",),          # shard batch tiles across TCs
        vmem_limit_bytes=32 * 1024 * 1024,          # safe on v5e/v6e/v7x scoped VMEM
    )

    compute_loss = y is not None
    if compute_loss:
        # y.unsqueeze(1).float(), padded to the tile multiple (masked in-kernel).
        y2d = jnp.pad(y.astype(jnp.float32).reshape(B, 1), ((0, bp - B), (0, 0)))
        kernel = functools.partial(_mlp_loss_kernel, tile_b=tb, batch=B)
        n_cols = 3
        in_specs = [x_spec, pl.BlockSpec((tb, 1), lambda i: (i, 0))] + weight_specs
        args = (x_bf16, y2d) + weight_args
    else:
        kernel = _mlp_infer_kernel
        n_cols = 2
        in_specs = [x_spec] + weight_specs
        args = (x_bf16,) + weight_args

    out = pl.pallas_call(
        kernel,
        grid=(n_tiles,),
        out_shape=jax.ShapeDtypeStruct((bp, n_cols), jnp.float32),
        in_specs=in_specs,
        out_specs=pl.BlockSpec((tb, n_cols), lambda i: (i, 0)),
        compiler_params=compiler_params,
    )(*args)

    result = {
        "predictions": out[:B, 0:1],
        "probabilities": out[:B, 1:2],
    }
    if compute_loss:
        result["loss"] = jnp.sum(out[:, 2]) / jnp.float32(B)
    return result


def init_params(key, input_dim, hidden_dim, output_dim):
    """Deterministic init matching the PyTorch Linear shapes.

    Weights stored transposed ([in, out]) for the kernel's x @ W layout; biases
    stored as [1, out] for in-kernel broadcasting.
    """
    dims = [
        (input_dim, hidden_dim),              # hidden_layer1
        (hidden_dim, hidden_dim // 2),        # hidden_layer2
        (hidden_dim // 2, hidden_dim // 4),   # hidden_layer3
        (hidden_dim // 4, output_dim),        # output_layer
    ]
    params = {}
    for i, (fan_in, fan_out) in enumerate(dims, start=1):
        key, kw, kb = jax.random.split(key, 3)
        bound = 1.0 / jnp.sqrt(jnp.float32(fan_in))
        params[f"w{i}"] = jax.random.uniform(
            kw, (fan_in, fan_out), jnp.float32, -bound, bound)
        params[f"b{i}"] = jax.random.uniform(
            kb, (1, fan_out), jnp.float32, -bound, bound)
    return params


def _reference_forward(x, y, params):
    """Pure-JAX f32 reference of MyClassifier.forward (for correctness checks)."""
    h = jax.nn.relu(x @ params["w1"] + params["b1"])
    h = jax.nn.relu(h @ params["w2"] + params["b2"])
    h = jax.nn.relu(h @ params["w3"] + params["b3"])
    pred = h @ params["w4"] + params["b4"]
    prob = jax.nn.sigmoid(pred)
    out = {"predictions": pred, "probabilities": prob}
    if y is not None:
        yv = y.astype(jnp.float32).reshape(-1, 1)
        log_p = jnp.maximum(jnp.log(prob), -100.0)
        log_1mp = jnp.maximum(jnp.log(1.0 - prob), -100.0)
        out["loss"] = jnp.mean(-(yv * log_p + (1.0 - yv) * log_1mp))
    return out


if __name__ == "__main__":
    # Small shapes consistent with the module: MLP over feature vectors,
    # binary classification head (output_dim=1 to match BCELoss + unsqueeze(1)).
    B, INPUT_DIM, HIDDEN_DIM, OUTPUT_DIM = 8, 32, 32, 1

    key = jax.random.PRNGKey(0)
    key, kx, ky, kp = jax.random.split(key, 4)

    x = jax.random.normal(kx, (B, INPUT_DIM), jnp.float32)
    y = jax.random.bernoulli(ky, 0.5, (B,)).astype(jnp.float32)
    params = init_params(kp, INPUT_DIM, HIDDEN_DIM, OUTPUT_DIM)

    # Train-style call (with loss).
    out = my_classifier_forward(x, y, params)
    jax.block_until_ready(out)
    assert out["predictions"].shape == (B, OUTPUT_DIM)
    assert out["probabilities"].shape == (B, OUTPUT_DIM)
    assert out["loss"].shape == ()

    ref = _reference_forward(x, y, params)
    assert jnp.allclose(out["predictions"], ref["predictions"], atol=0.1, rtol=0.1)
    assert jnp.allclose(out["probabilities"], ref["probabilities"], atol=0.05, rtol=0.1)
    assert jnp.allclose(out["loss"], ref["loss"], atol=0.05, rtol=0.1)

    # Inference-style call (y is None) -> separate loss-free kernel variant.
    out_inf = my_classifier_forward(x, None, params)
    jax.block_until_ready(out_inf)
    assert "loss" not in out_inf
    assert jnp.allclose(out_inf["predictions"], ref["predictions"], atol=0.1, rtol=0.1)

    # Multi-tile grid path: batch not a tile multiple (padding rows masked in loss).
    B2 = 20
    key, kx2 = jax.random.split(key)
    x2 = jax.random.normal(kx2, (B2, INPUT_DIM), jnp.float32)
    y2 = jnp.arange(B2, dtype=jnp.float32) % 2.0
    out2 = my_classifier_forward(x2, y2, params, batch_tile=8)
    jax.block_until_ready(out2)
    ref2 = _reference_forward(x2, y2, params)
    assert out2["predictions"].shape == (B2, OUTPUT_DIM)
    assert jnp.allclose(out2["predictions"], ref2["predictions"], atol=0.1, rtol=0.1)
    assert jnp.allclose(out2["loss"], ref2["loss"], atol=0.05, rtol=0.1)

    print("KERNEL_OK")
</pallas_src>

<mosaic_0001>
module attributes {stable_mosaic.version = 11 : i64} {
  func.func @_mlp_loss_kernel(%arg0: i32, %arg1: memref<8x32xbf16, #tpu.memory_space<vmem>>, %arg2: memref<8x1xf32, #tpu.memory_space<vmem>>, %arg3: memref<32x32xbf16, #tpu.memory_space<vmem>>, %arg4: memref<1x32xf32, #tpu.memory_space<vmem>>, %arg5: memref<32x16xbf16, #tpu.memory_space<vmem>>, %arg6: memref<1x16xf32, #tpu.memory_space<vmem>>, %arg7: memref<16x8xbf16, #tpu.memory_space<vmem>>, %arg8: memref<1x8xf32, #tpu.memory_space<vmem>>, %arg9: memref<1x8xf32, #tpu.memory_space<vmem>>, %arg10: memref<1x1xf32, #tpu.memory_space<vmem>>, %arg11: memref<8x3xf32, #tpu.memory_space<vmem>>) attributes {dimension_semantics = [#tpu.dimension_semantics<parallel>], iteration_bounds = array<i64: 1>, scalar_prefetch = 0 : i64, scratch_operands = 0 : i64, tpu.core_type = #tpu.core_type<tc>, window_params = [{transform_indices = @transform_0, window_bounds = array<i64: 8, 32>}, {transform_indices = @transform_1, window_bounds = array<i64: 8, 1>}, {pipeline_mode = #tpu.pipeline_mode<synchronous>, transform_indices = @transform_2, window_bounds = array<i64: 32, 32>}, {pipeline_mode = #tpu.pipeline_mode<synchronous>, transform_indices = @transform_3, window_bounds = array<i64: 1, 32>}, {pipeline_mode = #tpu.pipeline_mode<synchronous>, transform_indices = @transform_4, window_bounds = array<i64: 32, 16>}, {pipeline_mode = #tpu.pipeline_mode<synchronous>, transform_indices = @transform_5, window_bounds = array<i64: 1, 16>}, {pipeline_mode = #tpu.pipeline_mode<synchronous>, transform_indices = @transform_6, window_bounds = array<i64: 16, 8>}, {pipeline_mode = #tpu.pipeline_mode<synchronous>, transform_indices = @transform_7, window_bounds = array<i64: 1, 8>}, {pipeline_mode = #tpu.pipeline_mode<synchronous>, transform_indices = @transform_8, window_bounds = array<i64: 1, 8>}, {pipeline_mode = #tpu.pipeline_mode<synchronous>, transform_indices = @transform_9, window_bounds = array<i64: 1, 1>}, {transform_indices = @transform_10, window_bounds = array<i64: 8, 3>}]} {
    %c0 = arith.constant 0 : index
    %c0_0 = arith.constant 0 : index
    %0 = vector.load %arg1[%c0, %c0_0] : memref<8x32xbf16, #tpu.memory_space<vmem>>, vector<8x32xbf16>
    %c0_1 = arith.constant 0 : index
    %c0_2 = arith.constant 0 : index
    %1 = vector.load %arg3[%c0_1, %c0_2] : memref<32x32xbf16, #tpu.memory_space<vmem>>, vector<32x32xbf16>
    %c0_3 = arith.constant 0 : index
    %c0_4 = arith.constant 0 : index
    %2 = vector.load %arg4[%c0_3, %c0_4] : memref<1x32xf32, #tpu.memory_space<vmem>>, vector<1x32xf32>
    %c0_5 = arith.constant 0 : index
    %c0_6 = arith.constant 0 : index
    %3 = vector.load %arg5[%c0_5, %c0_6] : memref<32x16xbf16, #tpu.memory_space<vmem>>, vector<32x16xbf16>
    %c0_7 = arith.constant 0 : index
    %c0_8 = arith.constant 0 : index
    %4 = vector.load %arg6[%c0_7, %c0_8] : memref<1x16xf32, #tpu.memory_space<vmem>>, vector<1x16xf32>
    %c0_9 = arith.constant 0 : index
    %c0_10 = arith.constant 0 : index
    %5 = vector.load %arg7[%c0_9, %c0_10] : memref<16x8xbf16, #tpu.memory_space<vmem>>, vector<16x8xbf16>
    %c0_11 = arith.constant 0 : index
    %c0_12 = arith.constant 0 : index
    %6 = vector.load %arg8[%c0_11, %c0_12] : memref<1x8xf32, #tpu.memory_space<vmem>>, vector<1x8xf32>
    %c0_13 = arith.constant 0 : index
    %c0_14 = arith.constant 0 : index
    %7 = vector.load %arg9[%c0_13, %c0_14] : memref<1x8xf32, #tpu.memory_space<vmem>>, vector<1x8xf32>
    %c0_15 = arith.constant 0 : index
    %c0_16 = arith.constant 0 : index
    %8 = vector.load %arg10[%c0_15, %c0_16] : memref<1x1xf32, #tpu.memory_space<vmem>>, vector<1x1xf32>
    %cst = arith.constant dense<0.000000e+00> : vector<8x32xf32>
    %9 = tpu.matmul %0, %1, %cst {dimension_numbers = #tpu.dot_dimension_numbers<[1], [0], [0], [1], [0, 0, 1, 1], [], []>} : vector<8x32xbf16>, vector<32x32xbf16>, vector<8x32xf32> -> vector<8x32xf32>
    %10 = vector.broadcast %2 : vector<1x32xf32> to vector<8x32xf32>
    %11 = arith.addf %9, %10 : vector<8x32xf32>
    %cst_17 = arith.constant 0.000000e+00 : f32
    %12 = vector.broadcast %cst_17 : f32 to vector<8x32xf32>
    %13 = arith.maximumf %11, %12 : vector<8x32xf32>
    %14 = arith.truncf %13 : vector<8x32xf32> to vector<8x32xbf16>
    %cst_18 = arith.constant dense<0.000000e+00> : vector<8x16xf32>
    %15 = tpu.matmul %14, %3, %cst_18 {dimension_numbers = #tpu.dot_dimension_numbers<[1], [0], [0], [1], [0, 0, 1, 1], [], []>} : vector<8x32xbf16>, vector<32x16xbf16>, vector<8x16xf32> -> vector<8x16xf32>
    %16 = vector.broadcast %4 : vector<1x16xf32> to vector<8x16xf32>
    %17 = arith.addf %15, %16 : vector<8x16xf32>
    %cst_19 = arith.constant 0.000000e+00 : f32
    %18 = vector.broadcast %cst_19 : f32 to vector<8x16xf32>
    %19 = arith.maximumf %17, %18 : vector<8x16xf32>
    %20 = arith.truncf %19 : vector<8x16xf32> to vector<8x16xbf16>
    %cst_20 = arith.constant dense<0.000000e+00> : vector<8x8xf32>
    %21 = tpu.matmul %20, %5, %cst_20 {dimension_numbers = #tpu.dot_dimension_numbers<[1], [0], [0], [1], [0, 0, 1, 1], [], []>} : vector<8x16xbf16>, vector<16x8xbf16>, vector<8x8xf32> -> vector<8x8xf32>
    %22 = vector.broadcast %6 : vector<1x8xf32> to vector<8x8xf32>
    %23 = arith.addf %21, %22 : vector<8x8xf32>
    %cst_21 = arith.constant 0.000000e+00 : f32
    %24 = vector.broadcast %cst_21 : f32 to vector<8x8xf32>
    %25 = arith.maximumf %23, %24 : vector<8x8xf32>
    %26 = vector.broadcast %7 : vector<1x8xf32> to vector<8x8xf32>
    %27 = arith.mulf %25, %26 : vector<8x8xf32>
    %cst_22 = arith.constant dense<0.000000e+00> : vector<8xf32>
    %28 = vector.multi_reduction <add>, %27, %cst_22 [1] : vector<8x8xf32> to vector<8xf32>
    %29 = vector.shape_cast %28 : vector<8xf32> to vector<8x1xf32>
    %30 = vector.broadcast %8 : vector<1x1xf32> to vector<8x1xf32>
    %31 = arith.addf %29, %30 : vector<8x1xf32>
    %cst_23 = arith.constant 0.000000e+00 : f32
    %32 = vector.broadcast %cst_23 : f32 to vector<8x1xf32>
    %33 = arith.subf %32, %31 : vector<8x1xf32>
    %34 = math.exp %33 : vector<8x1xf32>
    %cst_24 = arith.constant 1.000000e+00 : f32
    %35 = vector.broadcast %cst_24 : f32 to vector<8x1xf32>
    %36 = arith.addf %35, %34 : vector<8x1xf32>
    %cst_25 = arith.constant 1.000000e+00 : f32
    %37 = vector.broadcast %cst_25 : f32 to vector<8x1xf32>
    %38 = arith.divf %37, %36 : vector<8x1xf32>
    %c0_26 = arith.constant 0 : index
    %c0_27 = arith.constant 0 : index
    %39 = vector.load %arg2[%c0_26, %c0_27] : memref<8x1xf32, #tpu.memory_space<vmem>>, vector<8x1xf32>
    %40 = math.log %38 : vector<8x1xf32>
    %cst_28 = arith.constant -1.000000e+02 : f32
    %41 = vector.broadcast %cst_28 : f32 to vector<8x1xf32>
    %42 = arith.maximumf %40, %41 : vector<8x1xf32>
    %cst_29 = arith.constant 1.000000e+00 : f32
    %43 = vector.broadcast %cst_29 : f32 to vector<8x1xf32>
    %44 = arith.subf %43, %38 : vector<8x1xf32>
    %45 = math.log %44 : vector<8x1xf32>
    %cst_30 = arith.constant -1.000000e+02 : f32
    %46 = vector.broadcast %cst_30 : f32 to vector<8x1xf32>
    %47 = arith.maximumf %45, %46 : vector<8x1xf32>
    %48 = arith.mulf %39, %42 : vector<8x1xf32>
    %cst_31 = arith.constant 1.000000e+00 : f32
    %49 = vector.broadcast %cst_31 : f32 to vector<8x1xf32>
    %50 = arith.subf %49, %39 : vector<8x1xf32>
    %51 = arith.mulf %50, %47 : vector<8x1xf32>
    %52 = arith.addf %48, %51 : vector<8x1xf32>
    %cst_32 = arith.constant 0.000000e+00 : f32
    %53 = vector.broadcast %cst_32 : f32 to vector<8x1xf32>
    %54 = arith.subf %53, %52 : vector<8x1xf32>
    %c8_i32 = arith.constant 8 : i32
    %55 = arith.muli %arg0, %c8_i32 : i32
    %56 = tpu.iota {dimensions = array<i32: 0>} : vector<8x1xi32>
    %57 = vector.broadcast %55 : i32 to vector<8x1xi32>
    %58 = arith.addi %57, %56 : vector<8x1xi32>
    %c8_i32_33 = arith.constant 8 : i32
    %59 = vector.broadcast %c8_i32_33 : i32 to vector<8x1xi32>
    %60 = arith.cmpi slt, %58, %59 : vector<8x1xi32>
    %cst_34 = arith.constant 0.000000e+00 : f32
    %61 = vector.broadcast %cst_34 : f32 to vector<8x1xf32>
    %62 = arith.select %60, %54, %61 : vector<8x1xi1>, vector<8x1xf32>
    %63 = tpu.concatenate %31, %38, %62 in 1 : vector<8x1xf32>, vector<8x1xf32>, vector<8x1xf32> -> vector<8x3xf32>
    %c0_35 = arith.constant 0 : index
    %c0_36 = arith.constant 0 : index
    %64 = vector.load %arg11[%c0_35, %c0_36] : memref<8x3xf32, #tpu.memory_space<vmem>>, vector<8x3xf32>
    tpu.vector_store %arg11[%c0_35, %c0_36], %63 {strides = array<i32>} : memref<8x3xf32, #tpu.memory_space<vmem>>, vector<8x3xf32>,
    return
  }
  func.func @transform_0(%arg0: i32) -> (i32, i32) {
    %c0_i32 = arith.constant 0 : i32
    %c0_i32_0 = arith.constant 0 : i32
    return %arg0, %c0_i32 : i32, i32
  }
  func.func @transform_1(%arg0: i32) -> (i32, i32) {
    %c0_i32 = arith.constant 0 : i32
    %c0_i32_0 = arith.constant 0 : i32
    return %arg0, %c0_i32 : i32, i32
  }
  func.func @transform_2(%arg0: i32) -> (i32, i32) {
    %c0_i32 = arith.constant 0 : i32
    %c0_i32_0 = arith.constant 0 : i32
    %c0_i32_1 = arith.constant 0 : i32
    return %c0_i32, %c0_i32_0 : i32, i32
  }
  func.func @transform_3(%arg0: i32) -> (i32, i32) {
    %c0_i32 = arith.constant 0 : i32
    %c0_i32_0 = arith.constant 0 : i32
    %c0_i32_1 = arith.constant 0 : i32
    return %c0_i32, %c0_i32_0 : i32, i32
  }
  func.func @transform_4(%arg0: i32) -> (i32, i32) {
    %c0_i32 = arith.constant 0 : i32
    %c0_i32_0 = arith.constant 0 : i32
    %c0_i32_1 = arith.constant 0 : i32
    return %c0_i32, %c0_i32_0 : i32, i32
  }
  func.func @transform_5(%arg0: i32) -> (i32, i32) {
    %c0_i32 = arith.constant 0 : i32
    %c0_i32_0 = arith.constant 0 : i32
    %c0_i32_1 = arith.constant 0 : i32
    return %c0_i32, %c0_i32_0 : i32, i32
  }
  func.func @transform_6(%arg0: i32) -> (i32, i32) {
    %c0_i32 = arith.constant 0 : i32
    %c0_i32_0 = arith.constant 0 : i32
    %c0_i32_1 = arith.constant 0 : i32
    return %c0_i32, %c0_i32_0 : i32, i32
  }
  func.func @transform_7(%arg0: i32) -> (i32, i32) {
    %c0_i32 = arith.constant 0 : i32
    %c0_i32_0 = arith.constant 0 : i32
    %c0_i32_1 = arith.constant 0 : i32
    return %c0_i32, %c0_i32_0 : i32, i32
  }
  func.func @transform_8(%arg0: i32) -> (i32, i32) {
    %c0_i32 = arith.constant 0 : i32
    %c0_i32_0 = arith.constant 0 : i32
    %c0_i32_1 = arith.constant 0 : i32
    return %c0_i32, %c0_i32_0 : i32, i32
  }
  func.func @transform_9(%arg0: i32) -> (i32, i32) {
    %c0_i32 = arith.constant 0 : i32
    %c0_i32_0 = arith.constant 0 : i32
    %c0_i32_1 = arith.constant 0 : i32
    return %c0_i32, %c0_i32_0 : i32, i32
  }
  func.func @transform_10(%arg0: i32) -> (i32, i32) {
    %c0_i32 = arith.constant 0 : i32
    %c0_i32_0 = arith.constant 0 : i32
    return %arg0, %c0_i32 : i32, i32
  }
}

</mosaic_0001>

<bundles_post_ra>
// kernel: tpu_custom_call.1
= control target key start
LH: loop header
LB: loop body
LE: loop exit
PB: predicated region body
PF: predicated region fallthrough
CT: control target
= control target key end

     0   :  { %vm69_vm0 = vcmask 261120   ;;  %vm130_vm1 = vcmask 130048   ;;  %vm152_vm2 = vcmask 64512   ;;  %s261_s29 = smov 2   ;;  %vm207_vm7 = vcmask 7168   ;;  %s356_s2 = inlined_call_operand.vmem [shape: bf16[32,32], index: 2, kind: input, shape index: {}]   ;;  %s357_s3 = inlined_call_operand.vmem [shape: f32[1,32], index: 3, kind: input, shape index: {}]   ;;  %s358_s0 = inlined_call_operand.vmem [shape: bf16[8,32], index: 0, kind: input, shape index: {}]   ;;  %s359_s5 = inlined_call_operand.vmem [shape: f32[1,16], index: 5, kind: input, shape index: {}]   ;;  %s360_s4 = inlined_call_operand.vmem [shape: bf16[32,16], index: 4, kind: input, shape index: {}]   ;;  %s361_s7 = inlined_call_operand.vmem [shape: f32[1,8], index: 7, kind: input, shape index: {}]   ;;  %s362_s6 = inlined_call_operand.vmem [shape: bf16[16,8], index: 6, kind: input, shape index: {}]   ;;  %s363_s8 = inlined_call_operand.vmem [shape: f32[1,8], index: 8, kind: input, shape index: {}]   ;;  %s364_s9 = inlined_call_operand.<no memory space> [shape: f32[1,1], index: 9, kind: input, shape index: {}]   ;;  %s365_s1 = inlined_call_operand.vmem [shape: f32[8,1], index: 1, kind: input, shape index: {}]   ;;  %s366_s10 = inlined_call_operand.vmem [shape: f32[8,3], index: 10, kind: output, shape index: {}]  }
   0x1   :  { %v241_v0 = vld [vmem:[%s356_s2 + $0x8] sm:$0xff]  ;;  %v240_v1 = vld [vmem:[%s356_s2] sm:$0xff]  ;;  %v15_v18 = vstv %s364_s9  ;;  %vm209_vm8 = vcmask 15360   ;;  %vm211_vm9 = vcmask 23552  }
   0x2   :  { %79 = vmatpush.bf16.msra.mxu0 %v241_v0  ;;  %v38_v2 = vld [vmem:[%s358_s0] sm:$0xf]  ;;  %v243_v3 = vld [vmem:[%s360_s4 + $0x8] sm:$0xff]  ;;  %16 = vst [vmem:[#allocation2] sm:$0x1] %v15_v18 }
   0x3   :  { %112 = vmatpush.bf16.msra.mxu1 %v243_v3  ;;  %v242_v4 = vld [vmem:[%s360_s4] sm:$0xff] }
   0x4   :  { %v247_v5 = vld [vmem:[%s357_s3] ss:$0 sm:$0xff] }
   0x5   :  { %v244_v11 = vld [vmem:[%s362_s6] sm:$0xff] }
   0x6   :  { %80 = vmatpush.bf16.msra.mxu0 %v240_v1  ;;  %141 = vmatpush.bf16.msra.mxu2 %v244_v11  ;;  %v248_v12 = vld [vmem:[%s359_s5] ss:$0 sm:$0xff] }
   0x7   :  { %113 = vmatpush.bf16.msra.mxu1 %v242_v4  ;;  %v249_v19 = vld [vmem:[%s361_s7] ss:$0 sm:$0xff]  ;;  %s260_s7 = smov 1  }
   0x8   :  { %v250_v22 = vld [vmem:[%s363_s8] ss:$0 sm:$0xff] }
   0x9   :  { %225 = vmatmul.msk.bf16.vlgmr.msra.gmra.mxu0 %vm69_vm0, %v38_v2  ;;  %v251_v27 = vld [vmem:[#allocation2] ss:$0 sm:$0xff] }
   0xa   :  { %v179_v46 = vld [vmem:[%s365_s1] sm:$0xff] }
   0xb   :  { %v188_v51 = vsub.f32 1.0, %v179_v46 }
  0x86   :  { %v82_v6 = vpop.f32.mrf.mxu0 }
  0x87   :  { %v83_v7 = vadd.f32 %v247_v5, %v82_v6 }
  0x89   :  { %v86_v8 = vmax.f32 %v83_v7, 0.0 }
  0x8b   :  { %v87_v9 = vpack.c.bf16 %v86_v8, %v86_v8 }
  0x8d   :  { %234 = vmatmul.msk.bf16.vlgmr.msra.gmra.mxu1 %vm69_vm0, %v87_v9 }
  0x8e   :  { %v84_v10 = vpop.f32.mrf.mxu0 }
 0x10a   :  { %v115_v13 = vpop.f32.mrf.mxu1 }
 0x10b   :  { %v116_v14 = vadd.f32 %v248_v12, %v115_v13 }
 0x10d   :  { %v119_v15 = vmax.f32 %v116_v14, 0.0 }
 0x10f   :  { %v120_v16 = vpack.c.bf16 %v119_v15, %v119_v15 }
 0x111   :  { %239 = vmatmul.msk.bf16.vlgmr.msra.gmra.mxu2 %vm130_vm1, %v120_v16 }
 0x112   :  { %v117_v17 = vpop.f32.mrf.mxu1 }
 0x194   :  { %v143_v20 = vpop.f32.mrf.mxu2 }
 0x195   :  { %v144_v21 = vadd.f32 %v249_v19, %v143_v20 }
 0x197   :  { %v147_v23 = vmax.f32 %v144_v21, 0.0 }
 0x199   :  { %v151_v24 = vmul.f32 %v250_v22, %v147_v23 }
 0x19b   :  { %v153_v25 = vsel %vm152_vm2, %v151_v24, 0.0 }
 0x19c   :  { %v145_v26 = vpop.f32.mrf.mxu2  ;;  %154 = vadd.xlane.f32.xlu0 %v153_v25 }
 0x20f   :  { %v155_v28 = vpop.xlane.xlu0 %154 }
 0x210   :  { %v159_v29 = vadd.f32 %v251_v27, %v155_v28 }
 0x212   :  { %v160_v30 = vsub.f32 0.0, %v159_v29 }
 0x214   :  { %v161_v31 = vmul.f32 1.442695, %v160_v30 }
 0x216   :  { %252 = vpow2.f32 %v161_v31 }
 0x21c   :  { %v253_v32 = vpop.eup %252 }
 0x21d   :  { %v163_v33 = vadd.f32 1.0, %v253_v32 }
 0x21f   :  { %254 = vrcp.f32 %v163_v33  ;;  %v175_v37 = vand.u32 2147483648, %v163_v33  ;;  %v173_v39 = vand.u32 2147483647, %v163_v33  ;;  %vm169_vm4 = vweird.f32 %v163_v33 }
 0x221   :  { %v176_v41 = vor.u32 1.1754944e-38, %v175_v37  ;;  %vm174_vm6 = vcmp.eq.f32.partialorder %v173_v39, 8.507059e+37 }
 0x225   :  { %v255_v34 = vpop.eup %254 }
 0x226   :  { %v165_v35 = vmul.f32 %v255_v34, %v163_v33  ;;  %vm170_vm3 = vweird.f32 %v255_v34 }
 0x227   :  { %vm171_vm5 = vmor %vm169_vm4, %vm170_vm3 }
 0x228   :  { %v166_v36 = vsub.f32 1.0, %v165_v35 }
 0x22a   :  { %v167_v38 = vmul.f32 %v255_v34, %v166_v36 }
 0x22c   :  { %v168_v40 = vadd.f32 %v255_v34, %v167_v38 }
 0x22e   :  { %v172_v42 = vsel %vm171_vm5, %v255_v34, %v168_v40 }
 0x22f   :  { %v177_v43 = vsel %vm174_vm6, %v176_v41, %v172_v42 }
 0x230   :  { %200 = vrot.lane.b32.xlu0 %v177_v43, %s260_s7  ;;  %256 = vlog2.f32 %v177_v43  ;;  %v183_v44 = vsub.f32 1.0, %v177_v43 }
 0x232   :  { %258 = vlog2.f32 %v183_v44 }
 0x236   :  { %v257_v45 = vpop.eup %256 }
 0x237   :  { %v181_v47 = vmul.f32 0.6931472, %v257_v45 }
 0x238   :  { %v259_v48 = vpop.eup %258 }
 0x239   :  { %v185_v49 = vmul.f32 0.6931472, %v259_v48  ;;  %v182_v50 = vmax.f32 %v181_v47, -100.0 }
 0x23b   :  { %v186_v52 = vmax.f32 %v185_v49, -100.0  ;;  %v187_v53 = vmul.f32 %v182_v50, %v179_v46 }
 0x23d   :  { %v189_v54 = vmul.f32 %v188_v51, %v186_v52 }
 0x23f   :  { %v190_v55 = vadd.f32 %v189_v54, %v187_v53 }
 0x241   :  { %v191_v56 = vsub.f32 0.0, %v190_v55 }
 0x243   :  { %204 = vrot.lane.b32.xlu1 %v191_v56, %s261_s29 }
 0x2a2   :  { %v201_v57 = vpop.permute.xlu0 %200 }
 0x2a3   :  { %v208_v58 = vsel %vm207_vm7, %v159_v29, %v201_v57 }
 0x2b5   :  { %v205_v59 = vpop.permute.xlu1 %204 }
 0x2b6   :  { %v210_v60 = vsel %vm209_vm8, %v208_v58, %v205_v59 }
 0x2b7   :  { %212 = vst.msk [vmem:[%s366_s10] sm:$0xff] %vm211_vm9, %v210_v60 }

</bundles_post_ra>
